<compile_context>
chip_gen: v6e
topology: v6e:2x2x1
jax: 0.10.0
libtpu: 0.0.40
codegen_flags: <defaults>
</compile_context>

<pallas_src>
import functools
import math

import jax
import jax.numpy as jnp
from jax.experimental import pallas as pl
from jax.experimental.pallas import tpu as pltpu

_LN_EPS = 1e-5


# ----------------------------------------------------------------------------
# Row-tiling helper
# ----------------------------------------------------------------------------
def _row_tiles(M, max_tm=512):
    """Largest row tile (multiple of 8, <= max_tm) dividing M, preferring >=2
    grid steps so the 'parallel' axis can shard across v7x's two TensorCores.
    Falls back to a single full-extent block (always legal) if M % 8 != 0."""
    if M % 8 != 0:
        return M, 1
    cap = min(max_tm, M // 2) if M >= 16 else min(max_tm, M)
    cap = max(8, (cap // 8) * 8)
    for cand in range(cap, 7, -8):
        if M % cand == 0:
            return cand, M // cand
    return M, 1


# ----------------------------------------------------------------------------
# Pallas kernels
# ----------------------------------------------------------------------------
def _norm_matmul_kernel(x_ref, w_ref, b_ref, o_ref, *, normalize, relu, eps):
    """(optional LayerNorm) -> x @ W + b -> (optional ReLU).
    LN gamma/beta are pre-folded into W / b on the host, so only the
    mean/variance normalization happens here."""
    x = x_ref[...]
    if normalize:
        mu = jnp.mean(x, axis=-1, keepdims=True)
        xc = x - mu
        var = jnp.mean(xc * xc, axis=-1, keepdims=True)
        x = xc * jax.lax.rsqrt(var + eps)
    acc = jnp.dot(x, w_ref[...], preferred_element_type=jnp.float32)
    acc = acc + b_ref[...]
    if relu:
        acc = jnp.maximum(acc, 0.0)
    o_ref[...] = acc.astype(o_ref.dtype)


def _matmul_residual_kernel(x_ref, w_ref, b_ref, res_ref, o_ref):
    """out = res + x @ W + b   (re_zero alpha already folded into W, b)."""
    acc = jnp.dot(x_ref[...], w_ref[...], preferred_element_type=jnp.float32)
    o_ref[...] = (acc + b_ref[...] + res_ref[...]).astype(o_ref.dtype)


def _layernorm_kernel(x_ref, g_ref, b_ref, o_ref, *, eps):
    x = x_ref[...]
    mu = jnp.mean(x, axis=-1, keepdims=True)
    xc = x - mu
    var = jnp.mean(xc * xc, axis=-1, keepdims=True)
    o_ref[...] = (xc * jax.lax.rsqrt(var + eps) * g_ref[...] + b_ref[...]
                  ).astype(o_ref.dtype)


def _attention_kernel(q_ref, k_ref, v_ref, o_ref, *, causal, scale):
    """One (batch, head): softmax(q k^T * scale [+ causal mask]) v."""
    q = q_ref[0]            # (Sq, Dh)
    k = k_ref[0]            # (Sk, Dh)
    v = v_ref[0]            # (Sk, Dh)
    s = jax.lax.dot_general(q, k, (((1,), (1,)), ((), ())),
                            preferred_element_type=jnp.float32) * scale
    if causal:
        sq, sk = s.shape
        row = jax.lax.broadcasted_iota(jnp.int32, (sq, sk), 0)
        col = jax.lax.broadcasted_iota(jnp.int32, (sq, sk), 1)
        s = jnp.where(col <= row, s, -1e30)
    m = jnp.max(s, axis=-1, keepdims=True)
    p = jnp.exp(s - m)
    p = p / jnp.sum(p, axis=-1, keepdims=True)
    out = jnp.dot(p, v, preferred_element_type=jnp.float32)
    o_ref[0] = out.astype(o_ref.dtype)


# ----------------------------------------------------------------------------
# Pallas wrappers
# ----------------------------------------------------------------------------
def _parallel(n_axes=1):
    return pltpu.CompilerParams(dimension_semantics=("parallel",) * n_axes)


def norm_matmul(x, w, b, *, normalize, relu=False, eps=_LN_EPS):
    """x: (M, K) f32, w: (K, N), b: (N,) -> (M, N) f32."""
    M, K = x.shape
    N = w.shape[1]
    tm, nt = _row_tiles(M)
    kern = functools.partial(_norm_matmul_kernel,
                             normalize=normalize, relu=relu, eps=eps)
    return pl.pallas_call(
        kern,
        out_shape=jax.ShapeDtypeStruct((M, N), jnp.float32),
        grid=(nt,),
        in_specs=[
            pl.BlockSpec((tm, K), lambda i: (i, 0)),
            pl.BlockSpec((K, N), lambda i: (0, 0)),   # weight resident, DMA'd once
            pl.BlockSpec((1, N), lambda i: (0, 0)),
        ],
        out_specs=pl.BlockSpec((tm, N), lambda i: (i, 0)),
        compiler_params=_parallel(),
    )(x, w, b.reshape(1, N))


def matmul_residual(x, w, b, res):
    """res + x @ w + b.  x: (M, K), w: (K, N), res: (M, N)."""
    M, K = x.shape
    N = w.shape[1]
    tm, nt = _row_tiles(M)
    return pl.pallas_call(
        _matmul_residual_kernel,
        out_shape=jax.ShapeDtypeStruct((M, N), jnp.float32),
        grid=(nt,),
        in_specs=[
            pl.BlockSpec((tm, K), lambda i: (i, 0)),
            pl.BlockSpec((K, N), lambda i: (0, 0)),
            pl.BlockSpec((1, N), lambda i: (0, 0)),
            pl.BlockSpec((tm, N), lambda i: (i, 0)),
        ],
        out_specs=pl.BlockSpec((tm, N), lambda i: (i, 0)),
        compiler_params=_parallel(),
    )(x, w, b.reshape(1, N), res)


def layer_norm_op(x, gamma, beta, eps=_LN_EPS):
    M, D = x.shape
    tm, nt = _row_tiles(M)
    return pl.pallas_call(
        functools.partial(_layernorm_kernel, eps=eps),
        out_shape=jax.ShapeDtypeStruct((M, D), jnp.float32),
        grid=(nt,),
        in_specs=[
            pl.BlockSpec((tm, D), lambda i: (i, 0)),
            pl.BlockSpec((1, D), lambda i: (0, 0)),
            pl.BlockSpec((1, D), lambda i: (0, 0)),
        ],
        out_specs=pl.BlockSpec((tm, D), lambda i: (i, 0)),
        compiler_params=_parallel(),
    )(x, gamma.reshape(1, D), beta.reshape(1, D))


def attention(q, k, v, *, causal):
    """q: (BH, Sq, Dh), k/v: (BH, Sk, Dh) -> (BH, Sq, Dh)."""
    BH, Sq, Dh = q.shape
    Sk = k.shape[1]
    scale = 1.0 / math.sqrt(Dh)
    kern = functools.partial(_attention_kernel, causal=causal, scale=scale)
    return pl.pallas_call(
        kern,
        out_shape=jax.ShapeDtypeStruct((BH, Sq, Dh), jnp.float32),
        grid=(BH,),
        in_specs=[
            pl.BlockSpec((1, Sq, Dh), lambda i: (i, 0, 0)),
            pl.BlockSpec((1, Sk, Dh), lambda i: (i, 0, 0)),
            pl.BlockSpec((1, Sk, Dh), lambda i: (i, 0, 0)),
        ],
        out_specs=pl.BlockSpec((1, Sq, Dh), lambda i: (i, 0, 0)),
        compiler_params=_parallel(),
    )(q, k, v)


# ----------------------------------------------------------------------------
# Parameter init (shapes / init follow the PyTorch module; folds done on host)
# ----------------------------------------------------------------------------
def _linear_init(key, fan_in, fan_out, bias=True):
    kw_, kb_ = jax.random.split(key)
    bound = 1.0 / math.sqrt(fan_in)
    w = jax.random.uniform(kw_, (fan_in, fan_out), jnp.float32, -bound, bound)
    b = (jax.random.uniform(kb_, (fan_out,), jnp.float32, -bound, bound)
         if bias else jnp.zeros((fan_out,), jnp.float32))
    return w, b


def _fold_ln(gamma, beta, w, b):
    """Fold LN's affine into the following Linear (exact):
       (xn*g + beta) @ W + b  ==  xn @ (g[:,None]*W) + (beta @ W + b)."""
    return gamma[:, None] * w, beta @ w + b


def _block_init(key, D, F, H, layer_norm, bias, re_zero, take_context_embedding):
    keys = jax.random.split(key, 10)
    p = {"layer_norm": layer_norm,
         "take_context_embedding": take_context_embedding,
         "num_heads": H}
    # LayerNorm params (PyTorch init: weight=1, bias=0 / None).
    ln_g = jnp.ones((D,), jnp.float32)
    ln_b = jnp.zeros((D,), jnp.float32)
    # re_zero alphas initialized to 0.0 exactly like the PyTorch module
    # (residual branches still execute; they are just scaled by 0 at init).
    alpha = jnp.float32(0.0) if re_zero else jnp.float32(1.0)

    # --- self-attention: q/k/v projections concatenated along the out dim ---
    wq, bq = _linear_init(keys[0], D, D, bias)
    wk, bk = _linear_init(keys[1], D, D, bias)
    wv, bv = _linear_init(keys[2], D, D, bias)
    w_qkv = jnp.concatenate([wq, wk, wv], axis=1)
    b_qkv = jnp.concatenate([bq, bk, bv], axis=0)
    if layer_norm:
        w_qkv, b_qkv = _fold_ln(ln_g, ln_b, w_qkv, b_qkv)
    p["w_qkv"], p["b_qkv"] = w_qkv, b_qkv
    wo, bo = _linear_init(keys[3], D, D, bias)
    p["w_o_sa"], p["b_o_sa"] = wo * alpha, bo * alpha      # re_zero fold (host)

    # --- cross-attention ---
    if take_context_embedding:
        wqc, bqc = _linear_init(keys[4], D, D, bias)
        if layer_norm:
            wqc, bqc = _fold_ln(ln_g, ln_b, wqc, bqc)
        p["w_q_ca"], p["b_q_ca"] = wqc, bqc
        wkc, bkc = _linear_init(keys[5], D, D, bias)
        wvc, bvc = _linear_init(keys[6], D, D, bias)
        p["w_kv_ca"] = jnp.concatenate([wkc, wvc], axis=1)
        p["b_kv_ca"] = jnp.concatenate([bkc, bvc], axis=0)
        woc, boc = _linear_init(keys[7], D, D, bias)
        p["w_o_ca"], p["b_o_ca"] = woc * alpha, boc * alpha

    # --- feed-forward MLP ---
    wfc, bfc = _linear_init(keys[8], D, F, bias)
    if layer_norm:
        wfc, bfc = _fold_ln(ln_g, ln_b, wfc, bfc)
    p["w_fc"], p["b_fc"] = wfc, bfc
    wff, bff = _linear_init(keys[9], F, D, bias)
    p["w_ff_out"], p["b_ff_out"] = wff * alpha, bff * alpha
    return p


def init_decoder_params(key, *, embd_size=256, fc_size=1024, num_heads=4,
                        num_layers=8, layer_norm=True, bias=True,
                        re_zero=True, take_context_embedding=True):
    assert embd_size % num_heads == 0
    layers = []
    for _ in range(num_layers):
        key, k = jax.random.split(key)
        layers.append(_block_init(k, embd_size, fc_size, num_heads,
                                  layer_norm, bias, re_zero,
                                  take_context_embedding))
    params = {"layers": layers, "embd_size": embd_size, "num_heads": num_heads}
    if layer_norm:
        params["final_ln"] = (jnp.ones((embd_size,), jnp.float32),
                              jnp.zeros((embd_size,), jnp.float32))
    else:
        params["final_ln"] = None
    return params


# ----------------------------------------------------------------------------
# Forward pass (eval mode, full-sequence decoding)
# ----------------------------------------------------------------------------
def _split_heads(x, B, S, H, Dh):
    return x.reshape(B, S, H, Dh).transpose(0, 2, 1, 3).reshape(B * H, S, Dh)


def _merge_heads(x, B, S, H, Dh):
    return x.reshape(B, H, S, Dh).transpose(0, 2, 1, 3).reshape(B * S, H * Dh)


def _decoder_block(x, mem_flat, p, B, S, Sm, H, Dh, *, is_causal):
    D = H * Dh
    ln = p["layer_norm"]

    # --- masked self-attention: LN1 + q/k/v projection fused in one kernel ---
    qkv = norm_matmul(x, p["w_qkv"], p["b_qkv"], normalize=ln)        # (M, 3D)
    q = _split_heads(qkv[:, :D], B, S, H, Dh)
    k = _split_heads(qkv[:, D:2 * D], B, S, H, Dh)
    v = _split_heads(qkv[:, 2 * D:], B, S, H, Dh)
    attn = attention(q, k, v, causal=is_causal)
    attn = _merge_heads(attn, B, S, H, Dh)
    # out_proj (re_zero alpha pre-folded) + residual add, fused.
    x = matmul_residual(attn, p["w_o_sa"], p["b_o_sa"], x)

    # --- cross-attention over memory ---
    if mem_flat is not None and p["take_context_embedding"]:
        qx = norm_matmul(x, p["w_q_ca"], p["b_q_ca"], normalize=ln)   # (M, D)
        kv = norm_matmul(mem_flat, p["w_kv_ca"], p["b_kv_ca"],
                         normalize=False)                             # (Mm, 2D)
        qh = _split_heads(qx, B, S, H, Dh)
        kh = _split_heads(kv[:, :D], B, Sm, H, Dh)
        vh = _split_heads(kv[:, D:], B, Sm, H, Dh)
        ca = attention(qh, kh, vh, causal=False)
        ca = _merge_heads(ca, B, S, H, Dh)
        x = matmul_residual(ca, p["w_o_ca"], p["b_o_ca"], x)

    # --- feed-forward: LN3 + fc + ReLU fused; out_proj + alpha + residual fused ---
    h = norm_matmul(x, p["w_fc"], p["b_fc"], normalize=ln, relu=True)  # (M, F)
    # TODO(synk): nn.Dropout is identity in eval mode; stochastic dropout not applied.
    x = matmul_residual(h, p["w_ff_out"], p["b_ff_out"], x)
    return x


def transformer_decoder_forward(tgt, params, memory=None, is_causal=True):
    """tgt: (B, S, D) f32, memory: optional (B, Sm, D) f32 -> (B, S, D) f32."""
    B, S, D = tgt.shape
    H = params["num_heads"]
    Dh = D // H
    x = tgt.astype(jnp.float32).reshape(B * S, D)
    mem_flat, Sm = None, 0
    if memory is not None:
        Bm, Sm, Dm = memory.shape
        assert Bm == B and Dm == D
        mem_flat = memory.astype(jnp.float32).reshape(Bm * Sm, D)
    # NOTE: the reference decoder builds an additive causal mask, but the block
    # drops it when tgt_key_padding_mask is None; we apply the intended causal
    # masking directly inside the attention kernel via `is_causal`.
    # TODO(synk): KV-cache incremental decoding and explicit attn/padding masks
    # are not implemented; full-sequence causal forward only.
    for p in params["layers"]:
        x = _decoder_block(x, mem_flat, p, B, S, Sm, H, Dh, is_causal=is_causal)
    if params["final_ln"] is not None:
        g, b = params["final_ln"]
        x = layer_norm_op(x, g, b)
    return x.reshape(B, S, D)


# ----------------------------------------------------------------------------
if __name__ == "__main__":
    key = jax.random.PRNGKey(0)
    kp, kt, km = jax.random.split(key, 3)

    # Small config consistent with the module (embd divisible by heads & 128).
    embd_size, fc_size, num_heads, num_layers = 256, 1024, 4, 2
    B, S, Sm = 2, 16, 16

    params = init_decoder_params(kp, embd_size=embd_size, fc_size=fc_size,
                                 num_heads=num_heads, num_layers=num_layers,
                                 layer_norm=True, bias=True, re_zero=True,
                                 take_context_embedding=True)

    tgt = jax.random.normal(kt, (B, S, embd_size), jnp.float32)
    memory = jax.random.normal(km, (B, Sm, embd_size), jnp.float32)

    out = transformer_decoder_forward(tgt, params, memory=memory, is_causal=True)
    out = jax.block_until_ready(out)

    assert out.shape == (B, S, embd_size), out.shape
    assert bool(jnp.all(jnp.isfinite(out))), "non-finite output"
    print("KERNEL_OK")
</pallas_src>

<mosaic_0001>
module attributes {stable_mosaic.version = 11 : i64} {
  func.func @_norm_matmul_kernel(%arg0: i32, %arg1: memref<16x256xf32, #tpu.memory_space<vmem>>, %arg2: memref<256x768xf32, #tpu.memory_space<vmem>>, %arg3: memref<1x768xf32, #tpu.memory_space<vmem>>, %arg4: memref<16x768xf32, #tpu.memory_space<vmem>>) attributes {dimension_semantics = [#tpu.dimension_semantics<parallel>], iteration_bounds = array<i64: 2>, scalar_prefetch = 0 : i64, scratch_operands = 0 : i64, tpu.core_type = #tpu.core_type<tc>, window_params = [{transform_indices = @transform_0, window_bounds = array<i64: 16, 256>}, {pipeline_mode = #tpu.pipeline_mode<synchronous>, transform_indices = @transform_1, window_bounds = array<i64: 256, 768>}, {pipeline_mode = #tpu.pipeline_mode<synchronous>, transform_indices = @transform_2, window_bounds = array<i64: 1, 768>}, {transform_indices = @transform_3, window_bounds = array<i64: 16, 768>}]} {
    %c0 = arith.constant 0 : index
    %c0_0 = arith.constant 0 : index
    %0 = vector.load %arg1[%c0, %c0_0] : memref<16x256xf32, #tpu.memory_space<vmem>>, vector<16x256xf32>
    %cst = arith.constant dense<0.000000e+00> : vector<16xf32>
    %1 = vector.multi_reduction <add>, %0, %cst [1] : vector<16x256xf32> to vector<16xf32>
    %2 = vector.shape_cast %1 : vector<16xf32> to vector<16x1xf32>
    %cst_1 = arith.constant 2.560000e+02 : f32
    %3 = vector.broadcast %cst_1 : f32 to vector<16x1xf32>
    %4 = arith.divf %2, %3 : vector<16x1xf32>
    %5 = vector.broadcast %4 : vector<16x1xf32> to vector<16x256xf32>
    %6 = arith.subf %0, %5 : vector<16x256xf32>
    %7 = arith.mulf %6, %6 : vector<16x256xf32>
    %cst_2 = arith.constant dense<0.000000e+00> : vector<16xf32>
    %8 = vector.multi_reduction <add>, %7, %cst_2 [1] : vector<16x256xf32> to vector<16xf32>
    %9 = vector.shape_cast %8 : vector<16xf32> to vector<16x1xf32>
    %cst_3 = arith.constant 2.560000e+02 : f32
    %10 = vector.broadcast %cst_3 : f32 to vector<16x1xf32>
    %11 = arith.divf %9, %10 : vector<16x1xf32>
    %cst_4 = arith.constant 9.99999974E-6 : f32
    %12 = vector.broadcast %cst_4 : f32 to vector<16x1xf32>
    %13 = arith.addf %11, %12 : vector<16x1xf32>
    %14 = math.rsqrt %13 : vector<16x1xf32>
    %15 = vector.broadcast %14 : vector<16x1xf32> to vector<16x256xf32>
    %16 = arith.mulf %6, %15 : vector<16x256xf32>
    %c0_5 = arith.constant 0 : index
    %c0_6 = arith.constant 0 : index
    %17 = vector.load %arg2[%c0_5, %c0_6] : memref<256x768xf32, #tpu.memory_space<vmem>>, vector<256x768xf32>
    %cst_7 = arith.constant dense<0.000000e+00> : vector<16x768xf32>
    %18 = tpu.matmul %16, %17, %cst_7 {dimension_numbers = #tpu.dot_dimension_numbers<[1], [0], [0], [1], [0, 0, 1, 1], [], []>} : vector<16x256xf32>, vector<256x768xf32>, vector<16x768xf32> -> vector<16x768xf32>
    %c0_8 = arith.constant 0 : index
    %c0_9 = arith.constant 0 : index
    %19 = vector.load %arg3[%c0_8, %c0_9] : memref<1x768xf32, #tpu.memory_space<vmem>>, vector<1x768xf32>
    %20 = vector.broadcast %19 : vector<1x768xf32> to vector<16x768xf32>
    %21 = arith.addf %18, %20 : vector<16x768xf32>
    %c0_10 = arith.constant 0 : index
    %c0_11 = arith.constant 0 : index
    %22 = vector.load %arg4[%c0_10, %c0_11] : memref<16x768xf32, #tpu.memory_space<vmem>>, vector<16x768xf32>
    tpu.vector_store %arg4[%c0_10, %c0_11], %21 {strides = array<i32>} : memref<16x768xf32, #tpu.memory_space<vmem>>, vector<16x768xf32>,
    return
  }
  func.func @transform_0(%arg0: i32) -> (i32, i32) {
    %c0_i32 = arith.constant 0 : i32
    %c0_i32_0 = arith.constant 0 : i32
    return %arg0, %c0_i32 : i32, i32
  }
  func.func @transform_1(%arg0: i32) -> (i32, i32) {
    %c0_i32 = arith.constant 0 : i32
    %c0_i32_0 = arith.constant 0 : i32
    %c0_i32_1 = arith.constant 0 : i32
    return %c0_i32, %c0_i32_0 : i32, i32
  }
  func.func @transform_2(%arg0: i32) -> (i32, i32) {
    %c0_i32 = arith.constant 0 : i32
    %c0_i32_0 = arith.constant 0 : i32
    %c0_i32_1 = arith.constant 0 : i32
    return %c0_i32, %c0_i32_0 : i32, i32
  }
  func.func @transform_3(%arg0: i32) -> (i32, i32) {
    %c0_i32 = arith.constant 0 : i32
    %c0_i32_0 = arith.constant 0 : i32
    return %arg0, %c0_i32 : i32, i32
  }
}

</mosaic_0001>

<bundles_post_ra>
// kernel: tpu_custom_call.1
= control target key start
LH: loop header
LB: loop body
LE: loop exit
PB: predicated region body
PF: predicated region fallthrough
CT: control target
= control target key end

     0   :  { %8 = vsyncpa [#allocation3], 0  ;;  %s1423_s0 = inlined_call_operand.hbm [shape: f32[32,256], index: 0, kind: input, shape index: {}]   ;;  %s1424_s1 = inlined_call_operand.hbm [shape: f32[256,768], index: 1, kind: input, shape index: {}]   ;;  %s1425_s2 = inlined_call_operand.hbm [shape: f32[1,768], index: 2, kind: input, shape index: {}]   ;;  %s1426_s3 = inlined_call_operand.hbm [shape: f32[32,768], index: 3, kind: output, shape index: {}]  }
   0x1   :  { %10 = vsyncpa [#allocation3 + $0x1], 0 }
   0x2   :  { %11 = vsyncpa [#allocation6], 0 }
   0x3   :  { %12 = vsyncpa [#allocation4], 0 }
   0x4   :  { %14 = vsyncpa [#allocation4 + $0x1], 0  ;;  %s1173_s12 = smov 0   ;;  %s1175_s13 = smov 0  }
   0x5   :  { %s1177_s14 = smov 0   ;;  %s1179_s15 = smov 0  }
   0x6 LB: > { %s1194_s16 = sadd.s32 4294967295, %s1141_s15   ;;  %s830_s17 = sadd.s32 4294967294, %s1141_s15   ;;  %s1141_s15 = sphi %s1179_s15, %s1448_s15   ;;  %s1137_s14 = sphi %s1177_s14, %s1447_s14   ;;  %s1133_s13 = sphi %s1175_s13, %s1446_s13   ;;  %s1129_s12 = sphi %s1173_s12, %s1445_s12  }
   0x7   : > { %p40_p0 = scmp.ne.s32.totalorder %s1133_s13, %s1129_s12  ;;  %p1427_p1 = scmp.eq.s32.totalorder %s1194_s16, 0 }
   0x8   : > { %p112_p3 = scmp.eq.s32.totalorder %s830_s17, 1  ;;  %p831_p5 = scmp.ge.s32.totalorder %s1141_s15, 1 }
   0x9   : > { %p1203_p4 = por %p1427_p1, %p40_p0  ;;  %p119_p7 = scmp.lt.s32.totalorder %s1141_s15, 3 }
   0xa   : > { %p1208_p6 = por %p112_p3, %p40_p0  ;;  %s1143_s21 = smov [#allocation5]  }
   0xb   : > { %s1431_s18 = scalar_select %p1203_p4, 1, 0 }
   0xc   : > { %s1432_s19 = scalar_select %p1208_p6, 1, 0 }
   0xd   : > { %p1213_p8 = pnand %p831_p5, %p119_p7  ;;  %s131_s22 = sshll.u32 %s1143_s21, 4  ;;  %s132_s22 = int_to_ptr.vmem [resolvable:$true] %s131_s22 }
   0xe   : > { %s1144_s24 = smov [#allocation7]   ;;  %s1004_s26 = scalar_lea.vmem %s132_s22, 24576 }
   0xf   : > { %s1433_s20 = scalar_select %p1213_p8, 1, 0 }
  0x10   : > { %p928_p9 = pneg %p1213_p8  ;;  %s145_s25 = sshll.u32 %s1144_s24, 4  ;;  %s146_s25 = int_to_ptr.vmem [resolvable:$true] %s145_s25 }
  0x11   : > { %p1005_p13 = scmp.ne.s32.totalorder %s132_s22, %s1004_s26  ;;  %p1012_p5 = scmp.lt.s32.totalorder %s132_s22, %s132_s22 }
  0x12   : > { %p1222_p11 = pnand %p928_p9, %p1427_p1  ;;  %p1013_p7 = scmp.lt.s32.totalorder %s1004_s26, %s1004_s26 }
  0x14   : > { %p995_p12 = pneg %p1222_p11  ;;  %p1014_p10 = por %p1013_p7, %p1012_p5 }
  0x16   : > { %p1007_p0 = pnand %p1005_p13, %p995_p12 }
  0x18   : > { %p1008_p3 = pneg %p1007_p0 }
  0x1a   : > { %p1015_p9 = pnand %p1014_p10, %p1008_p3 }
  0x1c   : > { %1018 = shalt.err (!%p1015_p9)
}
  0x1d   : > { %s1145_s27 = smov 768   ;;  %s1146_s28 = smov 48  }
  0x1e   : > { %931 = dma.hbm_to_vmem [thread:$0]  (!%p1222_p11), %s1424_s1, 24576, %s132_s22, [#allocation6], %s1145_s27, %s1145_s27, %s1146_s28  }
  0x1f   : > { %s1030_s4 = scalar_lea.vmem %s146_s25, 96  ;;  %p1038_p2 = scmp.lt.s32.totalorder %s146_s25, %s146_s25 }
  0x20   : > { %p1031_p1 = scmp.ne.s32.totalorder %s146_s25, %s1030_s4  ;;  %p1039_p6 = scmp.lt.s32.totalorder %s1030_s4, %s1030_s4 }
  0x22   : > { %p1033_p13 = pnand %p1031_p1, %p995_p12  ;;  %p1040_p5 = por %p1039_p6, %p1038_p2 }
  0x24   : > { %p1034_p0 = pneg %p1033_p13 }
  0x26   : > { %p1041_p10 = pnand %p1040_p5, %p1034_p0 }
  0x28   : > { %1044 = shalt.err (!%p1041_p10)
}
  0x29   : > { %934 = dma.hbm_to_vmem [thread:$0]  (!%p1222_p11), %s1425_s2, 96, %s146_s25, [#allocation6]  }
  0x2a   : > { %s1245_s7 = sadd.s32 1, %s1141_s15   ;;  %s27_s8 = sadd.s32 1, %s1137_s14 }
  0x2b   : > { %s24_s9 = ssub.s32 %s1141_s15, %s1245_s7  ;;  %p34_p1 = scmp.ne.s32.totalorder %s1137_s14, %s1133_s13 }
  0x2c   : > { %p25_p2 = scmp.eq.s32.totalorder %s24_s9, 0  ;;  %p35_p6 = scmp.eq.s32.totalorder %s1141_s15, 0 }
  0x2d   : > { %p1435_p12 = scmp.eq.s32.totalorder %s1194_s16, 1  ;;  %p945_p7 = scmp.lt.s32.totalorder %s1141_s15, 2 }
  0x2e   : > { %s1261_s11 = scalar_select %p25_p2, %s1137_s14, %s27_s8  }
  0x2f   : > { %p1255_p3 = por %p1435_p12, %p34_p1  ;;  %p36_p9 = por %p35_p6, %p34_p1 }
  0x30   : > { %s156_s17 = sand.u32 1, %s1137_s14   ;;  %s849_s22 = sshll.u32 %s1141_s15, 9 }
  0x31   : > { %s1436_s10 = scalar_select %p1255_p3, 1, 0 }
  0x32   : > { %s835_s21 = sshll.u32 %s156_s17, 5  ;;  %s1268_s25 = scalar_lea.hbm %s1423_s0, %s849_s22 }
  0x33   : > { %s160_s26 = scalar_lea.vmem [#allocation2], %s835_s21  ;;  %p1272_p11 = pnand %p945_p7, %p36_p9 }
  0x34   : > { %s168_s27 = sshll.u32 %s160_s26, 4  ;;  %s1276_s29 = scalar_lea.sflag [#allocation3], %s156_s17  ;;  %s1270_s27 = int_to_ptr.vmem [resolvable:$true] %s168_s27 }
  0x35   : > { %s1045_s30 = scalar_lea.hbm %s1268_s25, 512  ;;  %p1047_p0 = pneg %p1272_p11 }
  0x36   : > { %p1046_p13 = scmp.ne.s32.totalorder %s1268_s25, %s1045_s30  ;;  %s1050_s6 = scalar_lea.hbm %s1423_s0, 1024 }
  0x37   : > { %p1051_p1 = scmp.lt.s32.totalorder %s1268_s25, %s1423_s0  ;;  %p1052_p2 = scmp.lt.s32.totalorder %s1050_s6, %s1045_s30 }
  0x38   : > { %p1048_p5 = pnand %p1047_p0, %p1046_p13 }
  0x39   : > { %p1053_p6 = por %p1052_p2, %p1051_p1 }
  0x3a   : > { %p1049_p10 = pneg %p1048_p5 }
  0x3c   : > { %p1054_p12 = pnand %p1053_p6, %p1049_p10 }
  0x3e   : > { %1057 = shalt.err (!%p1054_p12)
}
  0x3f   : > { %s1058_s17 = scalar_lea.vmem %s1270_s27, 512  ;;  %s1147_s21 = smov [#allocation2]  }
  0x40   : > { %p1059_p7 = scmp.ne.s32.totalorder %s1270_s27, %s1058_s17  ;;  %s1063_s22 = sshll.u32 %s1147_s21, 4  ;;  %s1064_s22 = int_to_ptr.vmem [resolvable:$false] %s1063_s22 }
  0x41   : > { %s1065_s23 = scalar_lea.vmem %s1064_s22, 1024  ;;  %p1066_p5 = scmp.lt.s32.totalorder %s1270_s27, %s1064_s22 }
  0x42   : > { %p1061_p9 = pnand %p1059_p7, %p1047_p0  ;;  %p1067_p3 = scmp.lt.s32.totalorder %s1065_s23, %s1058_s17 }
  0x44   : > { %p1062_p13 = pneg %p1061_p9  ;;  %p1068_p4 = por %p1067_p3, %p1066_p5 }
  0x46   : > { %p1069_p8 = pnand %p1068_p4, %p1062_p13 }
  0x48   : > { %1072 = shalt.err (!%p1069_p8)
}
  0x49   : > { %s1148_s24 = smov 256   ;;  %s1149_s26 = smov 16  }
  0x4a   : > { %938 = dma.hbm_to_vmem [thread:$0]  (!%p1272_p11), %s1268_s25, 512, %s1270_s27, %s1276_s29, %s1148_s24, %s1148_s24, %s1149_s26  }
  0x4b   : > { %p1438_p0 = scmp.ne.s32.totalorder %s1433_s20, 0 }
  0x4c   : > { %s1300_s30 = sand.u32 (!%p1438_p0), 1, %s1133_s13   ;;  %p1439_p4 = scmp.ne.s32.totalorder (!%p1438_p0), %s1431_s18, 0 }
  0x4d   : > { %180 = sbr.rel (%p1438_p0) target bundleno = 672 (0x2a0), region = 32  ;;  %s840_s4 = sshll.u32 (!%p1438_p0), %s1300_s30, 5 }
  0x4e   : > { %s183_s5 = scalar_lea.sflag (!%p1438_p0), [#allocation3], %s1300_s30  ;;  %s186_s6 = scalar_lea.vmem (!%p1438_p0), [#allocation2], %s840_s4 }
  0x52   : > { %1116 = dma.done.wait (%p1439_p4), %s183_s5, 512  }
  0x53   : > { %1118 = vsyncadd (%p1439_p4), %s183_s5, 4294966784  ;;  %p1440_p8 = scmp.eq.s32.totalorder %s1194_s16, 0 }
  0x55   : > { %1120 = dma.done.wait (%p1440_p8), [#allocation6], 24672   ;;  %p1441_p3 = pmov %p1440_p8 }
  0x56   : > { %v1312_v0 = vld [vmem:[%s186_s6] sm:$0xff]  ;;  %v1314_v1 = vld [vmem:[%s186_s6 + $0x8] sm:$0xff]  ;;  %v1316_v2 = vld [vmem:[%s186_s6 + $0x10] sm:$0xff]  ;;  %s914_s18 = smul.u32 96, %s1300_s30  ;;  %p1442_p10 = scmp.ne.s32.totalorder %s1436_s10, 0 }
  0x57   : > { %1122 = vsyncadd (%p1441_p3), [#allocation6], 4294942624  ;;  %v223_v3 = vadd.f32 %v1314_v1, %v1312_v0  ;;  %v1320_v4 = vld [vmem:[%s186_s6 + $0x18] sm:$0xff]  ;;  %v349_v7 = vld [vmem:[#allocation5 + $0x2e8] sm:$0xff]  ;;  %s915_s25 = smul.u32 1536, %s1194_s16  ;;  %s724_s16 = scalar_lea.sflag [#allocation4], %s1300_s30 }
  0x58   : > { %v226_v5 = vadd.f32 %v1320_v4, %v1316_v2  ;;  %v347_v6 = vld [vmem:[#allocation5 + $0x2d8] sm:$0xff]  ;;  %v346_v8 = vld [vmem:[#allocation5 + $0x2d0] sm:$0xff]  ;;  %557 = vmatprep.subr.mxu1 %v349_v7  ;;  %v348_v9 = vld [vmem:[#allocation5 + $0x2e0] sm:$0xff]  ;;  %s1359_s20 = scalar_lea.vmem [#allocation8], %s914_s18  ;;  %s1150_s17 = smov [#allocation8]  }
  0x59   : > { %224 = vadd.xlane.f32.xlu0 %v223_v3  ;;  %480 = vmatprep.subr.mxu0 %v347_v6  ;;  %v341_v10 = vld [vmem:[#allocation5 + $0x2a8] sm:$0xff]  ;;  %v343_v11 = vld [vmem:[#allocation5 + $0x2b8] sm:$0xff]  ;;  %v340_v12 = vld [vmem:[#allocation5 + $0x2a0] sm:$0xff]  ;;  %s738_s27 = sshll.u32 %s1359_s20, 4  ;;  %s1374_s8 = scalar_lea.hbm %s1426_s3, %s915_s25  ;;  %s1376_s27 = int_to_ptr.vmem [resolvable:$true] %s738_s27 }
  0x5a   : > { %481 = vmatpush1.msra.mxu0 %v346_v8  ;;  %558 = vmatpush1.msra.mxu1 %v348_v9  ;;  %v342_v13 = vld [vmem:[#allocation5 + $0x2b0] sm:$0xff]  ;;  %v335_v14 = vld [vmem:[#allocation5 + $0x278] sm:$0xff]  ;;  %v337_v15 = vld [vmem:[#allocation5 + $0x288] sm:$0xff]  ;;  %s1073_s9 = scalar_lea.vmem %s1376_s27, 1536  ;;  %s1077_s21 = sshll.u32 %s1150_s17, 4  ;;  %s1078_s21 = int_to_ptr.vmem [resolvable:$false] %s1077_s21 }
  0x5b   : > { %482 = vmatprep.subr.mxu0 %v341_v10  ;;  %559 = vmatprep.subr.mxu1 %v343_v11  ;;  %v334_v16 = vld [vmem:[#allocation5 + $0x270] sm:$0xff]  ;;  %v336_v17 = vld [vmem:[#allocation5 + $0x280] sm:$0xff]  ;;  %v329_v18 = vld [vmem:[#allocation5 + $0x248] sm:$0xff]  ;;  %p1074_p11 = scmp.ne.s32.totalorder %s1376_s27, %s1073_s9  ;;  %s1079_s22 = scalar_lea.vmem %s1078_s21, 3072 }
  0x5c   : > { %483 = vmatpush1.msra.mxu0 %v340_v12  ;;  %560 = vmatpush1.msra.mxu1 %v342_v13  ;;  %v331_v19 = vld [vmem:[#allocation5 + $0x258] sm:$0xff]  ;;  %v328_v20 = vld [vmem:[#allocation5 + $0x240] sm:$0xff]  ;;  %v330_v21 = vld [vmem:[#allocation5 + $0x250] sm:$0xff]  ;;  %p1080_p6 = scmp.lt.s32.totalorder %s1376_s27, %s1078_s21  ;;  %p1081_p12 = scmp.lt.s32.totalorder %s1079_s22, %s1073_s9 }
  0x5d   : > { %227 = vadd.xlane.f32.xlu0 %v226_v5  ;;  %484 = vmatprep.subr.mxu0 %v335_v14  ;;  %v323_v22 = vld [vmem:[#allocation5 + $0x218] sm:$0xff]  ;;  %v325_v23 = vld [vmem:[#allocation5 + $0x228] sm:$0xff]  ;;  %v322_v24 = vld [vmem:[#allocation5 + $0x210] sm:$0xff]  ;;  %p1075_p1 = pnand %p1074_p11, %p1442_p10 }
  0x5e   : > { %561 = vmatprep.subr.mxu1 %v337_v15  ;;  %485 = vmatpush1.msra.mxu0 %v334_v16  ;;  %v324_v25 = vld [vmem:[#allocation5 + $0x220] sm:$0xff]  ;;  %v317_v26 = vld [vmem:[#allocation5 + $0x1e8] sm:$0xff]  ;;  %v319_v27 = vld [vmem:[#allocation5 + $0x1f8] sm:$0xff]  ;;  %p1082_p7 = por %p1081_p12, %p1080_p6 }
  0x5f   : > { %562 = vmatpush1.msra.mxu1 %v336_v17  ;;  %486 = vmatprep.subr.mxu0 %v329_v18  ;;  %v316_v28 = vld [vmem:[#allocation5 + $0x1e0] sm:$0xff]  ;;  %v318_v29 = vld [vmem:[#allocation5 + $0x1f0] sm:$0xff]  ;;  %v311_v30 = vld [vmem:[#allocation5 + $0x1b8] sm:$0xff]  ;;  %p1076_p2 = pneg %p1075_p1 }
  0x60   : > { %563 = vmatprep.subr.mxu1 %v331_v19  ;;  %487 = vmatpush1.msra.mxu0 %v328_v20  ;;  %v313_v31 = vld [vmem:[#allocation5 + $0x1c8] sm:$0xff]  ;;  %v310_v32 = vld [vmem:[#allocation5 + $0x1b0] sm:$0xff]  ;;  %v312_v33 = vld [vmem:[#allocation5 + $0x1c0] sm:$0xff] }
  0x61   : > { %564 = vmatpush1.msra.mxu1 %v330_v21  ;;  %488 = vmatprep.subr.mxu0 %v323_v22  ;;  %v305_v34 = vld [vmem:[#allocation5 + $0x188] sm:$0xff]  ;;  %v307_v35 = vld [vmem:[#allocation5 + $0x198] sm:$0xff]  ;;  %v304_v36 = vld [vmem:[#allocation5 + $0x180] sm:$0xff]  ;;  %p1083_p9 = pnand %p1082_p7, %p1076_p2 }
  0x62   : > { %565 = vmatprep.subr.mxu1 %v325_v23  ;;  %489 = vmatpush1.msra.mxu0 %v322_v24  ;;  %v306_v37 = vld [vmem:[#allocation5 + $0x190] sm:$0xff]  ;;  %v299_v38 = vld [vmem:[#allocation5 + $0x158] sm:$0xff]  ;;  %v301_v39 = vld [vmem:[#allocation5 + $0x168] sm:$0xff] }
  0x63   : > { %566 = vmatpush1.msra.mxu1 %v324_v25  ;;  %490 = vmatprep.subr.mxu0 %v317_v26  ;;  %v298_v40 = vld [vmem:[#allocation5 + $0x150] sm:$0xff]  ;;  %v300_v41 = vld [vmem:[#allocation5 + $0x160] sm:$0xff]  ;;  %v293_v42 = vld [vmem:[#allocation5 + $0x128] sm:$0xff] }
  0x64   : > { %567 = vmatprep.subr.mxu1 %v319_v27  ;;  %491 = vmatpush1.msra.mxu0 %v316_v28  ;;  %v295_v43 = vld [vmem:[#allocation5 + $0x138] sm:$0xff]  ;;  %v292_v44 = vld [vmem:[#allocation5 + $0x120] sm:$0xff]  ;;  %v294_v45 = vld [vmem:[#allocation5 + $0x130] sm:$0xff] }
  0x65   : > { %568 = vmatpush1.msra.mxu1 %v318_v29  ;;  %492 = vmatprep.subr.mxu0 %v311_v30  ;;  %v287_v46 = vld [vmem:[#allocation5 + $0xf8] sm:$0xff]  ;;  %v289_v47 = vld [vmem:[#allocation5 + $0x108] sm:$0xff]  ;;  %v286_v48 = vld [vmem:[#allocation5 + $0xf0] sm:$0xff] }
  0x66   : > { %569 = vmatprep.subr.mxu1 %v313_v31  ;;  %493 = vmatpush1.msra.mxu0 %v310_v32  ;;  %v288_v49 = vld [vmem:[#allocation5 + $0x100] sm:$0xff]  ;;  %v281_v50 = vld [vmem:[#allocation5 + $0xc8] sm:$0xff]  ;;  %v283_v51 = vld [vmem:[#allocation5 + $0xd8] sm:$0xff] }
  0x67   : > { %570 = vmatpush1.msra.mxu1 %v312_v33  ;;  %494 = vmatprep.subr.mxu0 %v305_v34  ;;  %v280_v52 = vld [vmem:[#allocation5 + $0xc0] sm:$0xff]  ;;  %v282_v53 = vld [vmem:[#allocation5 + $0xd0] sm:$0xff]  ;;  %v275_v54 = vld [vmem:[#allocation5 + $0x98] sm:$0xff] }
  0x68   : > { %571 = vmatprep.subr.mxu1 %v307_v35  ;;  %495 = vmatpush1.msra.mxu0 %v304_v36  ;;  %v277_v55 = vld [vmem:[#allocation5 + $0xa8] sm:$0xff]  ;;  %v274_v56 = vld [vmem:[#allocation5 + $0x90] sm:$0xff]  ;;  %v276_v57 = vld [vmem:[#allocation5 + $0xa0] sm:$0xff] }
  0x69   : > { %572 = vmatpush1.msra.mxu1 %v306_v37  ;;  %496 = vmatprep.subr.mxu0 %v299_v38  ;;  %v269_v58 = vld [vmem:[#allocation5 + $0x68] sm:$0xff]  ;;  %v271_v59 = vld [vmem:[#allocation5 + $0x78] sm:$0xff]  ;;  %v268_v60 = vld [vmem:[#allocation5 + $0x60] sm:$0xff] }
  0x6a   : > { %573 = vmatprep.subr.mxu1 %v301_v39  ;;  %497 = vmatpush1.msra.mxu0 %v298_v40  ;;  %v270_v61 = vld [vmem:[#allocation5 + $0x70] sm:$0xff]  ;;  %v263_v62 = vld [vmem:[#allocation5 + $0x38] sm:$0xff]  ;;  %v265_v63 = vld [vmem:[#allocation5 + $0x48] sm:$0xff] }
  0x6b   : > { %574 = vmatpush1.msra.mxu1 %v300_v41  ;;  %498 = vmatprep.subr.mxu0 %v293_v42  ;;  %v262_v3 = vld [vmem:[#allocation5 + $0x30] sm:$0xff]  ;;  %v264_v5 = vld [vmem:[#allocation5 + $0x40] sm:$0xff]  ;;  %v257_v6 = vld [vmem:[#allocation5 + $0x8] sm:$0xff] }
  0x6c   : > { %575 = vmatprep.subr.mxu1 %v295_v43  ;;  %499 = vmatpush1.msra.mxu0 %v292_v44  ;;  %v259_v7 = vld [vmem:[#allocation5 + $0x18] sm:$0xff]  ;;  %v256_v8 = vld [vmem:[#allocation5] sm:$0xff]  ;;  %v258_v9 = vld [vmem:[#allocation5 + $0x10] sm:$0xff] }
  0x6d   : > { %576 = vmatpush1.msra.mxu1 %v294_v45  ;;  %500 = vmatprep.subr.mxu0 %v287_v46  ;;  %v443_v10 = vld [vmem:[#allocation5 + $0x5d8] sm:$0xff]  ;;  %v445_v11 = vld [vmem:[#allocation5 + $0x5e8] sm:$0xff]  ;;  %v442_v12 = vld [vmem:[#allocation5 + $0x5d0] sm:$0xff] }
  0x6e   : > { %577 = vmatprep.subr.mxu1 %v289_v47  ;;  %501 = vmatpush1.msra.mxu0 %v286_v48  ;;  %v444_v13 = vld [vmem:[#allocation5 + $0x5e0] sm:$0xff]  ;;  %v437_v14 = vld [vmem:[#allocation5 + $0x5a8] sm:$0xff]  ;;  %v439_v15 = vld [vmem:[#allocation5 + $0x5b8] sm:$0xff] }
  0x6f   : > { %578 = vmatpush1.msra.mxu1 %v288_v49  ;;  %502 = vmatprep.subr.mxu0 %v281_v50  ;;  %v436_v16 = vld [vmem:[#allocation5 + $0x5a0] sm:$0xff]  ;;  %v438_v17 = vld [vmem:[#allocation5 + $0x5b0] sm:$0xff]  ;;  %v431_v18 = vld [vmem:[#allocation5 + $0x578] sm:$0xff] }
  0x70   : > { %579 = vmatprep.subr.mxu1 %v283_v51  ;;  %503 = vmatpush1.msra.mxu0 %v280_v52  ;;  %v433_v19 = vld [vmem:[#allocation5 + $0x588] sm:$0xff]  ;;  %v430_v20 = vld [vmem:[#allocation5 + $0x570] sm:$0xff]  ;;  %v432_v21 = vld [vmem:[#allocation5 + $0x580] sm:$0xff] }
  0x71   : > { %580 = vmatpush1.msra.mxu1 %v282_v53  ;;  %504 = vmatprep.subr.mxu0 %v275_v54  ;;  %v425_v22 = vld [vmem:[#allocation5 + $0x548] sm:$0xff]  ;;  %v427_v23 = vld [vmem:[#allocation5 + $0x558] sm:$0xff]  ;;  %v424_v24 = vld [vmem:[#allocation5 + $0x540] sm:$0xff] }
  0x72   : > { %581 = vmatprep.subr.mxu1 %v277_v55  ;;  %505 = vmatpush1.msra.mxu0 %v274_v56  ;;  %v426_v25 = vld [vmem:[#allocation5 + $0x550] sm:$0xff]  ;;  %v419_v26 = vld [vmem:[#allocation5 + $0x518] sm:$0xff]  ;;  %v421_v27 = vld [vmem:[#allocation5 + $0x528] sm:$0xff] }
  0x73   : > { %582 = vmatpush1.msra.mxu1 %v276_v57  ;;  %506 = vmatprep.subr.mxu0 %v269_v58  ;;  %v418_v28 = vld [vmem:[#allocation5 + $0x510] sm:$0xff]  ;;  %v420_v29 = vld [vmem:[#allocation5 + $0x520] sm:$0xff]  ;;  %v413_v30 = vld [vmem:[#allocation5 + $0x4e8] sm:$0xff] }
  0x74   : > { %583 = vmatprep.subr.mxu1 %v271_v59  ;;  %507 = vmatpush1.msra.mxu0 %v268_v60  ;;  %v415_v31 = vld [vmem:[#allocation5 + $0x4f8] sm:$0xff]  ;;  %v412_v32 = vld [vmem:[#allocation5 + $0x4e0] sm:$0xff]  ;;  %v414_v33 = vld [vmem:[#allocation5 + $0x4f0] sm:$0xff] }
  0x75   : > { %584 = vmatpush1.msra.mxu1 %v270_v61  ;;  %508 = vmatprep.subr.mxu0 %v263_v62  ;;  %v407_v46 = vld [vmem:[#allocation5 + $0x4b8] sm:$0xff]  ;;  %v409_v47 = vld [vmem:[#allocation5 + $0x4c8] sm:$0xff]  ;;  %v406_v48 = vld [vmem:[#allocation5 + $0x4b0] sm:$0xff] }
  0x76   : > { %585 = vmatprep.subr.mxu1 %v265_v63  ;;  %509 = vmatpush1.msra.mxu0 %v262_v3  ;;  %v403_v49 = vld [vmem:[#allocation5 + $0x498] sm:$0xff]  ;;  %v400_v50 = vld [vmem:[#allocation5 + $0x480] sm:$0xff]  ;;  %v402_v51 = vld [vmem:[#allocation5 + $0x490] sm:$0xff] }
  0x77   : > { %586 = vmatpush1.msra.mxu1 %v264_v5  ;;  %510 = vmatprep.subr.mxu0 %v257_v6  ;;  %v395_v52 = vld [vmem:[#allocation5 + $0x458] sm:$0xff]  ;;  %v397_v53 = vld [vmem:[#allocation5 + $0x468] sm:$0xff]  ;;  %v394_v54 = vld [vmem:[#allocation5 + $0x450] sm:$0xff] }
  0x78   : > { %587 = vmatprep.subr.mxu1 %v259_v7  ;;  %511 = vmatpush1.msra.mxu0 %v256_v8  ;;  %v396_v55 = vld [vmem:[#allocation5 + $0x460] sm:$0xff]  ;;  %v389_v56 = vld [vmem:[#allocation5 + $0x428] sm:$0xff]  ;;  %v391_v57 = vld [vmem:[#allocation5 + $0x438] sm:$0xff] }
  0x79   : > { %588 = vmatpush1.msra.mxu1 %v258_v9  ;;  %512 = vmatprep.subr.mxu0 %v443_v10  ;;  %v388_v58 = vld [vmem:[#allocation5 + $0x420] sm:$0xff]  ;;  %v390_v59 = vld [vmem:[#allocation5 + $0x430] sm:$0xff]  ;;  %v383_v60 = vld [vmem:[#allocation5 + $0x3f8] sm:$0xff] }
  0x7a   : > { %589 = vmatprep.subr.mxu1 %v445_v11  ;;  %513 = vmatpush2.msra.mxu0 %v442_v12  ;;  %v385_v61 = vld [vmem:[#allocation5 + $0x408] sm:$0xff]  ;;  %v382_v62 = vld [vmem:[#allocation5 + $0x3f0] sm:$0xff]  ;;  %v384_v63 = vld [vmem:[#allocation5 + $0x400] sm:$0xff] }
  0x7b   : > { %590 = vmatpush2.msra.mxu1 %v444_v13  ;;  %514 = vmatprep.subr.mxu0 %v437_v14  ;;  %v377_v3 = vld [vmem:[#allocation5 + $0x3c8] sm:$0xff]  ;;  %v379_v5 = vld [vmem:[#allocation5 + $0x3d8] sm:$0xff]  ;;  %v376_v6 = vld [vmem:[#allocation5 + $0x3c0] sm:$0xff] }
  0x7c   : > { %591 = vmatprep.subr.mxu1 %v439_v15  ;;  %515 = vmatpush2.msra.mxu0 %v436_v16  ;;  %v378_v7 = vld [vmem:[#allocation5 + $0x3d0] sm:$0xff]  ;;  %v371_v8 = vld [vmem:[#allocation5 + $0x398] sm:$0xff]  ;;  %v373_v9 = vld [vmem:[#allocation5 + $0x3a8] sm:$0xff] }
  0x7d   : > { %592 = vmatpush2.msra.mxu1 %v438_v17  ;;  %516 = vmatprep.subr.mxu0 %v431_v18  ;;  %v370_v10 = vld [vmem:[#allocation5 + $0x390] sm:$0xff]  ;;  %v372_v11 = vld [vmem:[#allocation5 + $0x3a0] sm:$0xff]  ;;  %v365_v12 = vld [vmem:[#allocation5 + $0x368] sm:$0xff] }
  0x7e   : > { %593 = vmatprep.subr.mxu1 %v433_v19  ;;  %517 = vmatpush2.msra.mxu0 %v430_v20  ;;  %v367_v13 = vld [vmem:[#allocation5 + $0x378] sm:$0xff]  ;;  %v364_v14 = vld [vmem:[#allocation5 + $0x360] sm:$0xff]  ;;  %v366_v15 = vld [vmem:[#allocation5 + $0x370] sm:$0xff] }
  0x7f   : > { %594 = vmatpush2.msra.mxu1 %v432_v21  ;;  %518 = vmatprep.subr.mxu0 %v425_v22  ;;  %v359_v16 = vld [vmem:[#allocation5 + $0x338] sm:$0xff]  ;;  %v361_v17 = vld [vmem:[#allocation5 + $0x348] sm:$0xff]  ;;  %v358_v18 = vld [vmem:[#allocation5 + $0x330] sm:$0xff] }
  0x80   : > { %595 = vmatprep.subr.mxu1 %v427_v23  ;;  %519 = vmatpush2.msra.mxu0 %v424_v24  ;;  %v360_v19 = vld [vmem:[#allocation5 + $0x340] sm:$0xff]  ;;  %v353_v20 = vld [vmem:[#allocation5 + $0x308] sm:$0xff]  ;;  %v355_v21 = vld [vmem:[#allocation5 + $0x318] sm:$0xff] }
  0x81   : > { %596 = vmatpush2.msra.mxu1 %v426_v25  ;;  %520 = vmatprep.subr.mxu0 %v419_v26  ;;  %v352_v22 = vld [vmem:[#allocation5 + $0x300] sm:$0xff]  ;;  %v354_v23 = vld [vmem:[#allocation5 + $0x310] sm:$0xff]  ;;  %v351_v24 = vld [vmem:[#allocation5 + $0x2f8] sm:$0xff] }
  0x82   : > { %597 = vmatprep.subr.mxu1 %v421_v27  ;;  %521 = vmatpush2.msra.mxu0 %v418_v28 }
  0x83   : > { %598 = vmatpush2.msra.mxu1 %v420_v29  ;;  %522 = vmatprep.subr.mxu0 %v413_v30 }
  0x84   : > { %599 = vmatprep.subr.mxu1 %v415_v31  ;;  %523 = vmatpush2.msra.mxu0 %v412_v32 }
  0x85   : > { %600 = vmatpush2.msra.mxu1 %v414_v33  ;;  %524 = vmatprep.subr.mxu0 %v407_v46  ;;  %v315_v46 = vld [vmem:[#allocation5 + $0x1d8] sm:$0xff] }
  0x86   : > { %601 = vmatprep.subr.mxu1 %v409_v47  ;;  %525 = vmatpush2.msra.mxu0 %v406_v48  ;;  %v314_v47 = vld [vmem:[#allocation5 + $0x1d0] sm:$0xff]  ;;  %v309_v48 = vld [vmem:[#allocation5 + $0x1a8] sm:$0xff] }
  0xe2   : > { %v225_v34 = vpop.xlane.xlu0 %224 }
  0xe3   : > { %v230_v35 = vmul.f32 0.00390625, %v225_v34  ;;  %v350_v34 = vld [vmem:[#allocation5 + $0x2f0] sm:$0xff] }
  0xe5   : > { %v1325_v36 = vsub.f32 %v1312_v0, %v230_v35  ;;  %v1328_v37 = vsub.f32 %v1314_v1, %v230_v35  ;;  %v345_v35 = vld [vmem:[#allocation5 + $0x2c8] sm:$0xff] }
  0xe6   : > { %v228_v38 = vpop.xlane.xlu0 %227 }
  0xe7   : > { %v231_v39 = vmul.f32 0.00390625, %v228_v38  ;;  %v236_v40 = vmul.f32 %v1325_v36, %v1325_v36  ;;  %v237_v41 = vmul.f32 %v1328_v37, %v1328_v37 }
  0xe9   : > { %v1335_v42 = vsub.f32 %v1316_v2, %v231_v39  ;;  %v1338_v43 = vsub.f32 %v1320_v4, %v231_v39  ;;  %v240_v44 = vadd.f32 %v237_v41, %v236_v40  ;;  %v408_v2 = vld [vmem:[#allocation5 + $0x4c0] sm:$0xff]  ;;  %v401_v4 = vld [vmem:[#allocation5 + $0x488] sm:$0xff]  ;;  %v338_v41 = vld [vmem:[#allocation5 + $0x290] sm:$0xff] }
  0xea   : > { %602 = vmatpush2.msra.mxu1 %v408_v2  ;;  %526 = vmatprep.subr.mxu0 %v401_v4  ;;  %v344_v39 = vld [vmem:[#allocation5 + $0x2c0] sm:$0xff]  ;;  %v303_v4 = vld [vmem:[#allocation5 + $0x178] sm:$0xff] }
  0xeb   : > { %241 = vadd.xlane.f32.xlu1 %v240_v44  ;;  %v238_v0 = vmul.f32 %v1335_v42, %v1335_v42  ;;  %v239_v1 = vmul.f32 %v1338_v43, %v1338_v43  ;;  %603 = vmatprep.subr.mxu1 %v403_v49  ;;  %v333_v44 = vld [vmem:[#allocation5 + $0x268] sm:$0xff]  ;;  %v308_v2 = vld [vmem:[#allocation5 + $0x1a0] sm:$0xff]  ;;  %v302_v49 = vld [vmem:[#allocation5 + $0x170] sm:$0xff] }
  0xec   : > { %527 = vmatpush2.msra.mxu0 %v400_v50  ;;  %604 = vmatpush2.msra.mxu1 %v402_v51  ;;  %v297_v50 = vld [vmem:[#allocation5 + $0x148] sm:$0xff]  ;;  %v296_v51 = vld [vmem:[#allocation5 + $0x140] sm:$0xff] }
  0xed   : > { %v243_v45 = vadd.f32 %v239_v1, %v238_v0  ;;  %528 = vmatprep.subr.mxu0 %v395_v52  ;;  %605 = vmatprep.subr.mxu1 %v397_v53  ;;  %v327_v0 = vld [vmem:[#allocation5 + $0x238] sm:$0xff]  ;;  %v321_v1 = vld [vmem:[#allocation5 + $0x208] sm:$0xff]  ;;  %v290_v53 = vld [vmem:[#allocation5 + $0x110] sm:$0xff] }
  0xee   : > { %529 = vmatpush2.msra.mxu0 %v394_v54  ;;  %606 = vmatpush2.msra.mxu1 %v396_v55  ;;  %v291_v52 = vld [vmem:[#allocation5 + $0x118] sm:$0xff]  ;;  %v285_v54 = vld [vmem:[#allocation5 + $0xe8] sm:$0xff]  ;;  %v284_v55 = vld [vmem:[#allocation5 + $0xe0] sm:$0xff] }
  0xef   : > { %244 = vadd.xlane.f32.xlu1 %v243_v45  ;;  %530 = vmatprep.subr.mxu0 %v389_v56  ;;  %v320_v45 = vld [vmem:[#allocation5 + $0x200] sm:$0xff]  ;;  %v279_v56 = vld [vmem:[#allocation5 + $0xb8] sm:$0xff] }
  0xf0   : > { %607 = vmatprep.subr.mxu1 %v391_v57  ;;  %531 = vmatpush2.msra.mxu0 %v388_v58  ;;  %v278_v57 = vld [vmem:[#allocation5 + $0xb0] sm:$0xff]  ;;  %v273_v58 = vld [vmem:[#allocation5 + $0x88] sm:$0xff] }
  0xf1   : > { %608 = vmatpush2.msra.mxu1 %v390_v59  ;;  %532 = vmatprep.subr.mxu0 %v383_v60  ;;  %v272_v59 = vld [vmem:[#allocation5 + $0x80] sm:$0xff]  ;;  %v267_v60 = vld [vmem:[#allocation5 + $0x58] sm:$0xff] }
  0xf2   : > { %609 = vmatprep.subr.mxu1 %v385_v61  ;;  %533 = vmatpush2.msra.mxu0 %v382_v62  ;;  %v266_v61 = vld [vmem:[#allocation5 + $0x50] sm:$0xff]  ;;  %v261_v62 = vld [vmem:[#allocation5 + $0x28] sm:$0xff] }
  0xf3   : > { %610 = vmatpush2.msra.mxu1 %v384_v63  ;;  %534 = vmatprep.subr.mxu0 %v377_v3  ;;  %v260_v63 = vld [vmem:[#allocation5 + $0x20] sm:$0xff]  ;;  %v447_v3 = vld [vmem:[#allocation5 + $0x5f8] sm:$0xff] }
  0xf4   : > { %611 = vmatprep.subr.mxu1 %v379_v5  ;;  %535 = vmatpush2.msra.mxu0 %v376_v6  ;;  %v446_v5 = vld [vmem:[#allocation5 + $0x5f0] sm:$0xff]  ;;  %v441_v6 = vld [vmem:[#allocation5 + $0x5c8] sm:$0xff] }
  0xf5   : > { %612 = vmatpush2.msra.mxu1 %v378_v7  ;;  %536 = vmatprep.subr.mxu0 %v371_v8  ;;  %v440_v7 = vld [vmem:[#allocation5 + $0x5c0] sm:$0xff]  ;;  %v435_v8 = vld [vmem:[#allocation5 + $0x598] sm:$0xff] }
  0xf6   : > { %613 = vmatprep.subr.mxu1 %v373_v9  ;;  %537 = vmatpush2.msra.mxu0 %v370_v10  ;;  %v434_v9 = vld [vmem:[#allocation5 + $0x590] sm:$0xff]  ;;  %v429_v10 = vld [vmem:[#allocation5 + $0x568] sm:$0xff] }
  0xf7   : > { %614 = vmatpush2.msra.mxu1 %v372_v11  ;;  %538 = vmatprep.subr.mxu0 %v365_v12  ;;  %v428_v11 = vld [vmem:[#allocation5 + $0x560] sm:$0xff]  ;;  %v423_v12 = vld [vmem:[#allocation5 + $0x538] sm:$0xff] }
  0xf8   : > { %615 = vmatprep.subr.mxu1 %v367_v13  ;;  %539 = vmatpush2.msra.mxu0 %v364_v14  ;;  %v422_v13 = vld [vmem:[#allocation5 + $0x530] sm:$0xff]  ;;  %v417_v14 = vld [vmem:[#allocation5 + $0x508] sm:$0xff] }
  0xf9   : > { %616 = vmatpush2.msra.mxu1 %v366_v15  ;;  %540 = vmatprep.subr.mxu0 %v359_v16  ;;  %v416_v15 = vld [vmem:[#allocation5 + $0x500] sm:$0xff]  ;;  %v411_v16 = vld [vmem:[#allocation5 + $0x4d8] sm:$0xff] }
  0xfa   : > { %617 = vmatprep.subr.mxu1 %v361_v17  ;;  %541 = vmatpush2.msra.mxu0 %v358_v18  ;;  %v410_v17 = vld [vmem:[#allocation5 + $0x4d0] sm:$0xff]  ;;  %v405_v18 = vld [vmem:[#allocation5 + $0x4a8] sm:$0xff] }
  0xfb   : > { %618 = vmatpush2.msra.mxu1 %v360_v19  ;;  %542 = vmatprep.subr.mxu0 %v353_v20  ;;  %v404_v19 = vld [vmem:[#allocation5 + $0x4a0] sm:$0xff]  ;;  %v399_v20 = vld [vmem:[#allocation5 + $0x478] sm:$0xff] }
  0xfc   : > { %619 = vmatprep.subr.mxu1 %v355_v21  ;;  %543 = vmatpush2.msra.mxu0 %v352_v22  ;;  %v398_v21 = vld [vmem:[#allocation5 + $0x470] sm:$0xff]  ;;  %v393_v22 = vld [vmem:[#allocation5 + $0x448] sm:$0xff] }
  0xfd   : > { %620 = vmatpush2.msra.mxu1 %v354_v23  ;;  %634 = vmatprep.subr.mxu0 %v351_v24  ;;  %v392_v23 = vld [vmem:[#allocation5 + $0x440] sm:$0xff] }
  0xfe   : > { %850 = vmatprep.subr.mxu1 %v351_v24  ;;  %v387_v24 = vld [vmem:[#allocation5 + $0x418] sm:$0xff] }
 0x174   : > { %v242_v25 = vpop.xlane.xlu1 %241 }
 0x175   : > { %v246_v26 = vmul.f32 0.00390625, %v242_v25  ;;  %v386_v25 = vld [vmem:[#allocation5 + $0x410] sm:$0xff] }
 0x177   : > { %v248_v27 = vadd.f32 1e-05, %v246_v26  ;;  %v381_v26 = vld [vmem:[#allocation5 + $0x3e8] sm:$0xff] }
 0x178   : > { %v245_v28 = vpop.xlane.xlu1 %244 }
 0x179   : > { %989 = vrsqrt.f32 %v248_v27  ;;  %v247_v29 = vmul.f32 0.00390625, %v245_v28  ;;  %v380_v27 = vld [vmem:[#allocation5 + $0x3e0] sm:$0xff]  ;;  %v375_v28 = vld [vmem:[#allocation5 + $0x3b8] sm:$0xff] }
 0x17b   : > { %v249_v30 = vadd.f32 1e-05, %v247_v29  ;;  %v374_v29 = vld [vmem:[#allocation5 + $0x3b0] sm:$0xff] }
 0x17d   : > { %991 = vrsqrt.f32 %v249_v30  ;;  %v369_v30 = vld [vmem:[#allocation5 + $0x388] sm:$0xff] }
 0x186   : > { %v990_v31 = vpop.eup %989 }
 0x187   : > { %v253_v32 = vmul.f32 %v990_v31, %v1328_v37  ;;  %v1346_v33 = vmul.f32 %v990_v31, %v1325_v36  ;;  %v339_v37 = vld [vmem:[#allocation5 + $0x298] sm:$0xff]  ;;  %v368_v31 = vld [vmem:[#allocation5 + $0x380] sm:$0xff] }
 0x189   : > { %544 = vmatprep.mubr.f32.mxu0 %v253_v32  ;;  %621 = vmatprep.mubr.f32.mxu1 %v253_v32 }
 0x18a   : > { %v992_v38 = vpop.eup %991  ;;  %545 = vmatmul.mubr.f32.vlgmr.msra.gmra.mxu0 %v1346_v33  ;;  %622 = vmatmul.mubr.f32.vlgmr.msra.gmra.mxu1 %v1346_v33 }
 0x18b   : > { %635 = vmatpush1.msra.mxu0 %v350_v34  ;;  %882 = vmatpush1.msra.mxu1 %v350_v34  ;;  %v255_v40 = vmul.f32 %v992_v38, %v1338_v43  ;;  %v1352_v36 = vmul.f32 %v992_v38, %v1335_v42  ;;  %v332_v43 = vld [vmem:[#allocation5 + $0x260] sm:$0xff]  ;;  %v326_v42 = vld [vmem:[#allocation5 + $0x230] sm:$0xff] }
 0x18c   : > { %636 = vmatprep.subr.mxu0 %v345_v35  ;;  %851 = vmatprep.subr.mxu1 %v345_v35  ;;  %v362_v34 = vld [vmem:[#allocation5 + $0x350] sm:$0xff]  ;;  %v357_v35 = vld [vmem:[#allocation5 + $0x328] sm:$0xff]  ;;  %v356_v38 = vld [vmem:[#allocation5 + $0x320] sm:$0xff] }
 0x18d   : > { %637 = vmatpush1.msra.mxu0 %v344_v39  ;;  %883 = vmatpush1.msra.mxu1 %v344_v39  ;;  %v450_v39 = vlaneseq }
 0x18e   : > { %550 = vmatprep.mubr.f32.mxu0 %v255_v40  ;;  %627 = vmatprep.mubr.f32.mxu1 %v255_v40 }
 0x18f   : > { %638 = vmatprep.subr.mxu0 %v339_v37  ;;  %852 = vmatprep.subr.mxu1 %v339_v37 }
 0x190   : > { %551 = vmatmul.mubr.f32.gmra.mxu0 %v1352_v36  ;;  %628 = vmatmul.mubr.f32.gmra.mxu1 %v1352_v36 }
 0x191   : > { %639 = vmatpush1.msra.mxu0 %v338_v41  ;;  %884 = vmatpush1.msra.mxu1 %v338_v41 }
 0x192   : > { %640 = vmatprep.subr.mxu0 %v333_v44  ;;  %853 = vmatprep.subr.mxu1 %v333_v44  ;;  %v448_v44 = vld [vmem:[#allocation7] sm:$0x3f] }
 0x193   : > { %698 = vmatprep.mubr.f32.mxu0 %v253_v32  ;;  %704 = vmatprep.mubr.f32.mxu1 %v255_v40  ;;  %v363_v32 = vld [vmem:[#allocation5 + $0x358] sm:$0xff]  ;;  %v451_v40 = vshrl.u32 %v450_v39, 7 }
 0x194   : > { %641 = vmatpush1.msra.mxu0 %v332_v43  ;;  %885 = vmatpush1.msra.mxu1 %v332_v43 }
 0x195   : > { %642 = vmatprep.subr.mxu0 %v327_v0  ;;  %854 = vmatprep.subr.mxu1 %v327_v0  ;;  %v452_v37 = vsub.s32 0, %v451_v40  ;;  %v460_v41 = vsub.s32 2, %v451_v40  ;;  %v456_v43 = vsub.s32 1, %v451_v40  ;;  %v464_v0 = vsub.s32 3, %v451_v40 }
 0x196   : > { %643 = vmatpush1.msra.mxu0 %v326_v42  ;;  %886 = vmatpush1.msra.mxu1 %v326_v42 }
 0x197   : > { %644 = vmatprep.subr.mxu0 %v321_v1  ;;  %855 = vmatprep.subr.mxu1 %v321_v1  ;;  %v453_v42 = vrot.slane %v448_v44, %v452_v37  ;;  %v461_v1 = vrot.slane %v448_v44, %v460_v41 }
 0x198   : > { %645 = vmatpush1.msra.mxu0 %v320_v45  ;;  %887 = vmatpush1.msra.mxu1 %v320_v45  ;;  %v457_v45 = vrot.slane %v448_v44, %v456_v43 }
 0x199   : > { %646 = vmatprep.subr.mxu0 %v315_v46  ;;  %856 = vmatprep.subr.mxu1 %v315_v46  ;;  %v465_v46 = vrot.slane %v448_v44, %v464_v0 }
 0x19a   : > { %647 = vmatpush1.msra.mxu0 %v314_v47  ;;  %888 = vmatpush1.msra.mxu1 %v314_v47 }
 0x19b   : > { %648 = vmatprep.subr.mxu0 %v309_v48  ;;  %857 = vmatprep.subr.mxu1 %v309_v48 }
 0x19c   : > { %649 = vmatpush1.msra.mxu0 %v308_v2  ;;  %889 = vmatpush1.msra.mxu1 %v308_v2 }
 0x19d   : > { %650 = vmatprep.subr.mxu0 %v303_v4  ;;  %858 = vmatprep.subr.mxu1 %v303_v4 }
 0x19e   : > { %651 = vmatpush1.msra.mxu0 %v302_v49  ;;  %890 = vmatpush1.msra.mxu1 %v302_v49 }
 0x19f   : > { %652 = vmatprep.subr.mxu0 %v297_v50  ;;  %859 = vmatprep.subr.mxu1 %v297_v50 }
 0x1a0   : > { %653 = vmatpush1.msra.mxu0 %v296_v51  ;;  %891 = vmatpush1.msra.mxu1 %v296_v51 }
 0x1a1   : > { %654 = vmatprep.subr.mxu0 %v291_v52  ;;  %860 = vmatprep.subr.mxu1 %v291_v52 }
 0x1a2   : > { %655 = vmatpush1.msra.mxu0 %v290_v53  ;;  %892 = vmatpush1.msra.mxu1 %v290_v53 }
 0x1a3   : > { %656 = vmatprep.subr.mxu0 %v285_v54  ;;  %861 = vmatprep.subr.mxu1 %v285_v54 }
 0x1a4   : > { %657 = vmatpush1.msra.mxu0 %v284_v55  ;;  %893 = vmatpush1.msra.mxu1 %v284_v55 }
 0x1a5   : > { %658 = vmatprep.subr.mxu0 %v279_v56  ;;  %862 = vmatprep.subr.mxu1 %v279_v56 }
 0x1a6   : > { %659 = vmatpush1.msra.mxu0 %v278_v57  ;;  %894 = vmatpush1.msra.mxu1 %v278_v57 }
 0x1a7   : > { %660 = vmatprep.subr.mxu0 %v273_v58  ;;  %863 = vmatprep.subr.mxu1 %v273_v58 }
 0x1a8   : > { %661 = vmatpush1.msra.mxu0 %v272_v59  ;;  %895 = vmatpush1.msra.mxu1 %v272_v59  ;;  %v468_v59 = vsub.s32 4, %v451_v40 }
 0x1a9   : > { %662 = vmatprep.subr.mxu0 %v267_v60  ;;  %864 = vmatprep.subr.mxu1 %v267_v60  ;;  %v472_v60 = vsub.s32 5, %v451_v40 }
 0x1aa   : > { %663 = vmatpush1.msra.mxu0 %v266_v61  ;;  %896 = vmatpush1.msra.mxu1 %v266_v61  ;;  %v469_v61 = vrot.slane %v448_v44, %v468_v59 }
 0x1ab   : > { %664 = vmatprep.subr.mxu0 %v261_v62  ;;  %865 = vmatprep.subr.mxu1 %v261_v62  ;;  %v473_v62 = vrot.slane %v448_v44, %v472_v60 }
 0x1ac   : > { %665 = vmatpush1.msra.mxu0 %v260_v63  ;;  %897 = vmatpush1.msra.mxu1 %v260_v63 }
 0x1ad   : > { %666 = vmatprep.subr.mxu0 %v447_v3  ;;  %866 = vmatprep.subr.mxu1 %v447_v3 }
 0x1ae   : > { %667 = vmatpush2.msra.mxu0 %v446_v5  ;;  %898 = vmatpush2.msra.mxu1 %v446_v5 }
 0x1af   : > { %668 = vmatprep.subr.mxu0 %v441_v6  ;;  %867 = vmatprep.subr.mxu1 %v441_v6 }
 0x1b0   : > { %669 = vmatpush2.msra.mxu0 %v440_v7  ;;  %899 = vmatpush2.msra.mxu1 %v440_v7 }
 0x1b1   : > { %670 = vmatprep.subr.mxu0 %v435_v8  ;;  %868 = vmatprep.subr.mxu1 %v435_v8 }
 0x1b2   : > { %671 = vmatpush2.msra.mxu0 %v434_v9  ;;  %900 = vmatpush2.msra.mxu1 %v434_v9 }
 0x1b3   : > { %672 = vmatprep.subr.mxu0 %v429_v10  ;;  %869 = vmatprep.subr.mxu1 %v429_v10 }
 0x1b4   : > { %673 = vmatpush2.msra.mxu0 %v428_v11  ;;  %901 = vmatpush2.msra.mxu1 %v428_v11 }
 0x1b5   : > { %674 = vmatprep.subr.mxu0 %v423_v12  ;;  %870 = vmatprep.subr.mxu1 %v423_v12 }
 0x1b6   : > { %675 = vmatpush2.msra.mxu0 %v422_v13  ;;  %902 = vmatpush2.msra.mxu1 %v422_v13 }
 0x1b7   : > { %676 = vmatprep.subr.mxu0 %v417_v14  ;;  %871 = vmatprep.subr.mxu1 %v417_v14 }
 0x1b8   : > { %677 = vmatpush2.msra.mxu0 %v416_v15  ;;  %903 = vmatpush2.msra.mxu1 %v416_v15 }
 0x1b9   : > { %678 = vmatprep.subr.mxu0 %v411_v16  ;;  %872 = vmatprep.subr.mxu1 %v411_v16 }
 0x1ba   : > { %679 = vmatpush2.msra.mxu0 %v410_v17  ;;  %904 = vmatpush2.msra.mxu1 %v410_v17 }
 0x1bb   : > { %680 = vmatprep.subr.mxu0 %v405_v18  ;;  %873 = vmatprep.subr.mxu1 %v405_v18 }
 0x1bc   : > { %681 = vmatpush2.msra.mxu0 %v404_v19  ;;  %905 = vmatpush2.msra.mxu1 %v404_v19 }
 0x1bd   : > { %682 = vmatprep.subr.mxu0 %v399_v20  ;;  %874 = vmatprep.subr.mxu1 %v399_v20 }
 0x1be   : > { %683 = vmatpush2.msra.mxu0 %v398_v21  ;;  %906 = vmatpush2.msra.mxu1 %v398_v21 }
 0x1bf   : > { %684 = vmatprep.subr.mxu0 %v393_v22  ;;  %875 = vmatprep.subr.mxu1 %v393_v22 }
 0x1c0   : > { %685 = vmatpush2.msra.mxu0 %v392_v23  ;;  %907 = vmatpush2.msra.mxu1 %v392_v23 }
 0x1c1   : > { %686 = vmatprep.subr.mxu0 %v387_v24  ;;  %876 = vmatprep.subr.mxu1 %v387_v24 }
 0x1c2   : > { %687 = vmatpush2.msra.mxu0 %v386_v25  ;;  %908 = vmatpush2.msra.mxu1 %v386_v25 }
 0x1c3   : > { %688 = vmatprep.subr.mxu0 %v381_v26  ;;  %877 = vmatprep.subr.mxu1 %v381_v26 }
 0x1c4   : > { %689 = vmatpush2.msra.mxu0 %v380_v27  ;;  %909 = vmatpush2.msra.mxu1 %v380_v27 }
 0x1c5   : > { %690 = vmatprep.subr.mxu0 %v375_v28  ;;  %878 = vmatprep.subr.mxu1 %v375_v28 }
 0x1c6   : > { %691 = vmatpush2.msra.mxu0 %v374_v29  ;;  %910 = vmatpush2.msra.mxu1 %v374_v29 }
 0x1c7   : > { %692 = vmatprep.subr.mxu0 %v369_v30  ;;  %879 = vmatprep.subr.mxu1 %v369_v30 }
 0x1c8   : > { %693 = vmatpush2.msra.mxu0 %v368_v31  ;;  %911 = vmatpush2.msra.mxu1 %v368_v31 }
 0x1c9   : > { %694 = vmatprep.subr.mxu0 %v363_v32  ;;  %880 = vmatprep.subr.mxu1 %v363_v32 }
 0x1ca   : > { %695 = vmatpush2.msra.mxu0 %v362_v34  ;;  %912 = vmatpush2.msra.mxu1 %v362_v34 }
 0x1cb   : > { %696 = vmatprep.subr.mxu0 %v357_v35  ;;  %881 = vmatprep.subr.mxu1 %v357_v35 }
 0x1cc   : > { %697 = vmatpush2.msra.mxu0 %v356_v38  ;;  %913 = vmatpush2.msra.mxu1 %v356_v38 }
 0x1cd   : > { %699 = vmatmul.mubr.f32.vlgmr.msra.gmra.mxu0 %v1346_v33  ;;  %705 = vmatmul.mubr.f32.vlgmr.msra.gmra.mxu1 %v1352_v36 }
 0x24a   : > { %v546_v47 = vpop.f32.mrf.mxu0  ;;  %v623_v48 = vpop.f32.mrf.mxu1 }
 0x24b   : > { %v547_v2 = vadd.f32 %v546_v47, %v453_v42  ;;  %v624_v4 = vadd.f32 %v623_v48, %v461_v1 }
 0x24c   : > { %v548_v49 = vpop.f32.mrf.mxu0  ;;  %v625_v33 = vpop.f32.mrf.mxu1 }
 0x24d   : > { %711 = vst [vmem:[%s1359_s20] sm:$0xff] %v547_v2  ;;  %713 = vst [vmem:[%s1359_s20 + $0x10] sm:$0xff] %v624_v4  ;;  %v549_v36 = vadd.f32 %v548_v49, %v457_v45  ;;  %v626_v50 = vadd.f32 %v625_v33, %v465_v46 }
 0x24f   : > { %712 = vst [vmem:[%s1359_s20 + $0x8] sm:$0xff] %v549_v36  ;;  %714 = vst [vmem:[%s1359_s20 + $0x18] sm:$0xff] %v626_v50 }
 0x250   : > { %v552_v51 = vpop.f32.mrf.mxu0  ;;  %v629_v52 = vpop.f32.mrf.mxu1 }
 0x251   : > { %v553_v53 = vadd.f32 %v552_v51, %v453_v42  ;;  %v630_v54 = vadd.f32 %v629_v52, %v461_v1 }
 0x252   : > { %v554_v55 = vpop.f32.mrf.mxu0  ;;  %v631_v56 = vpop.f32.mrf.mxu1 }
 0x253   : > { %717 = vst [vmem:[%s1359_s20 + $0x30] sm:$0xff] %v553_v53  ;;  %719 = vst [vmem:[%s1359_s20 + $0x40] sm:$0xff] %v630_v54  ;;  %v555_v57 = vadd.f32 %v554_v55, %v457_v45  ;;  %v632_v58 = vadd.f32 %v631_v56, %v465_v46 }
 0x255   : > { %718 = vst [vmem:[%s1359_s20 + $0x38] sm:$0xff] %v555_v57  ;;  %720 = vst [vmem:[%s1359_s20 + $0x48] sm:$0xff] %v632_v58 }
 0x28d   : > { %v700_v63 = vpop.f32.mrf.mxu0  ;;  %v706_v3 = vpop.f32.mrf.mxu1 }
 0x28e   : > { %v701_v5 = vadd.f32 %v700_v63, %v469_v61  ;;  %v707_v6 = vadd.f32 %v706_v3, %v469_v61 }
 0x28f   : > { %v702_v7 = vpop.f32.mrf.mxu0  ;;  %v708_v8 = vpop.f32.mrf.mxu1 }
 0x290   : > { %715 = vst [vmem:[%s1359_s20 + $0x20] sm:$0xff] %v701_v5  ;;  %721 = vst [vmem:[%s1359_s20 + $0x50] sm:$0xff] %v707_v6  ;;  %v703_v9 = vadd.f32 %v702_v7, %v473_v62  ;;  %v709_v10 = vadd.f32 %v708_v8, %v473_v62 }
 0x292   : > { %716 = vst [vmem:[%s1359_s20 + $0x28] sm:$0xff] %v703_v9  ;;  %722 = vst [vmem:[%s1359_s20 + $0x58] sm:$0xff] %v709_v10 }
 0x293   : > { %1086 = shalt.err (!%p1083_p9)
}
 0x294   : > { %s1087_s23 = scalar_lea.hbm %s1374_s8, 1536  ;;  %s1091_s4 = scalar_lea.hbm %s1426_s3, 3072 }
 0x295   : > { %p1088_p13 = scmp.ne.s32.totalorder %s1374_s8, %s1087_s23  ;;  %p1092_p4 = scmp.lt.s32.totalorder %s1374_s8, %s1426_s3 }
 0x296   : > { %p1093_p8 = scmp.lt.s32.totalorder %s1091_s4, %s1087_s23 }
 0x297   : > { %p1089_p5 = pnand %p1088_p13, %p1442_p10 }
 0x298   : > { %p1094_p3 = por %p1093_p8, %p1092_p4 }
 0x299   : > { %p1090_p0 = pneg %p1089_p5 }
 0x29b   : > { %p1095_p11 = pnand %p1094_p3, %p1090_p0 }
 0x29d   : > { %1098 = shalt.err (!%p1095_p11)
}
 0x29e   : > { %s1151_s18 = smov 768   ;;  %s1152_s20 = smov 48  }
 0x29f   : > { %926 = dma.vmem_to_hbm [thread:$0]  (%p1442_p10), %s1376_s27, 1536, %s1374_s8, %s724_s16, %s1151_s18, %s1151_s18, %s1152_s20  }
 0x2a0 PF: > { %s753_s25 = sand.u32 1, %s1129_s12   ;;  %p1443_p1 = scmp.ne.s32.totalorder %s1432_s19, 0 }
 0x2a1   : > { %p1444_p2 = scmp.ge.s32.totalorder %s1141_s15, 2  ;;  %s754_s28 = scalar_lea.sflag [#allocation4], %s753_s25 }
 0x2a3   : > { %p940_p6 = pnand %p1444_p2, %p1443_p1 }
 0x2a5   : > { %p941_p12 = pneg %p940_p6 }
 0x2a7   : > { %1124 = dma.done.wait (%p941_p12), %s754_s28, 1536  }
 0x2a8   : > { %1126 = vsyncadd (%p941_p12), %s754_s28, 4294965760  ;;  %p17_p7 = scmp.ge.s32.totalorder %s1245_s7, 4   ;;  %s1445_s12 = smov %s1133_s13 }
 0x2a9   : > { %s1446_s13 = smov %s1137_s14  ;;  %s1447_s14 = smov %s1261_s11 }
 0x2aa   : > { %s1448_s15 = smov %s1245_s7  ;;  %19 = sbr.rel (!%p17_p7) target bundleno = 6 (0x6), region = 85 }
 0x2af   :  { %759 = vsyncpa [#allocation3], 1 }
 0x2b0   :  { %761 = vsyncpa [#allocation3 + $0x1], 1 }
 0x2b1   :  { %762 = vsyncpa [#allocation6], 1 }
 0x2b2   :  { %763 = vsyncpa [#allocation4], 1 }
 0x2b3   :  { %765 = vsyncpa [#allocation4 + $0x1], 1 }

</bundles_post_ra>
